<compile_context>
chip_gen: v7x
topology: tpu7x:2x2x1
jax: 0.10.0
libtpu: 0.0.40
codegen_flags: <defaults>
</compile_context>

<pallas_src>
import functools

import jax
import jax.numpy as jnp
from jax import lax
from jax.experimental import pallas as pl
from jax.experimental.pallas import tpu as pltpu

TAU = 0.07
_EPS = 1e-12     # F.normalize eps used by sentence_transformers util.cos_sim
_BIG = 1e30      # finite "-inf" for masking (avoids inf-inf NaNs)


def _round_up(x, m):
    return (x + m - 1) // m * m


def _ntxent_kernel(a_ref, t_ref, row_lse_ref, col_stats_ref, m_row, l_row,
                   *, inv_tau, tm, tn, n_valid, mask_rows, mask_cols):
    i = pl.program_id(0)          # audio row-block (outer, megacore-parallel)
    j = pl.program_id(1)          # text  col-block (inner reduction axis)
    nj = pl.num_programs(1)

    @pl.when(j == 0)
    def _init_row_stats():
        m_row[...] = jnp.full(m_row.shape, -_BIG, jnp.float32)
        l_row[...] = jnp.zeros(l_row.shape, jnp.float32)

    # sim[tm, tn] = (a_n @ t_n^T) / tau — bf16 operands on the MXU, f32 accumulate,
    # 1/tau applied in f32 post-matmul.
    sim = lax.dot_general(a_ref[...], t_ref[...],
                          (((1,), (0,)), ((), ())),
                          preferred_element_type=jnp.float32) * inv_tau

    # Padded text columns must not leak into valid rows' log-sum-exp.
    if mask_cols:
        col_ids = j * tn + lax.broadcasted_iota(jnp.int32, (1, tn), 1)
        sim_r = jnp.where(col_ids < n_valid, sim, -_BIG)
    else:
        sim_r = sim

    # ---- online row LSE (softmax over dim=1 of a2t); the ONLY full-tile exp ----
    m_prev = m_row[...]
    m_new = jnp.maximum(m_prev, jnp.max(sim_r, axis=1, keepdims=True))     # [tm,1]
    e = jnp.exp(sim_r - m_new)                                             # [tm,tn]
    l_row[...] = (l_row[...] * jnp.exp(m_prev - m_new)
                  + jnp.sum(e, axis=1, keepdims=True))
    m_row[...] = m_new

    # ---- per-tile column stats (t2a / column LSE), derived from `e` ----
    #   sum_i exp(sim_ij - cm_j) = exp(-cm_j) * sum_i exp(m_new_i) * e_ij
    # cm is computed on the unmasked sim (padded audio rows have sim == 0, which
    # only makes cm a looser finite reference); padded rows are dropped via `w`.
    cm = jnp.max(sim, axis=0, keepdims=True)                               # [1,tn]
    w = jnp.exp(m_new)                                                     # [tm,1]
    if mask_rows:
        row_ids = i * tm + lax.broadcasted_iota(jnp.int32, (tm, 1), 0)
        w = jnp.where(row_ids < n_valid, w, 0.0)
    cl = jnp.sum(e * w, axis=0, keepdims=True) * jnp.exp(-cm)              # [1,tn]
    col_stats_ref[0] = jnp.concatenate(
        [cm, cl, jnp.zeros((6, tn), jnp.float32)], axis=0)                 # [8,tn]

    # ---- row LSE writeback once per row block ----
    @pl.when(j == nj - 1)
    def _finish_rows():
        row_lse_ref[...] = m_row[...] + jnp.log(l_row[...])


def ntxent_loss(audio_embeds, text_embeds, labels=None, *, tau=TAU,
                block_m=256, block_n=256, mxu_dtype=jnp.bfloat16):
    """NTXent loss (scalar). `labels` accepted for parity with the PyTorch module
    but its forward pass never uses it. `mxu_dtype=jnp.bfloat16` feeds the MXU
    native bf16 operands (recommended); pass jnp.float32 for bit-faithful f32."""
    del labels
    n, d = audio_embeds.shape
    assert text_embeds.shape == (n, d)
    inv_tau = float(1.0 / tau)

    # ---- hoisted out of the kernel: L2-normalize once, cast for the MXU ----
    a32 = audio_embeds.astype(jnp.float32)
    t32 = text_embeds.astype(jnp.float32)
    a_n = a32 * lax.rsqrt(jnp.maximum(jnp.sum(a32 * a32, axis=-1, keepdims=True),
                                      _EPS * _EPS))
    t_n = t32 * lax.rsqrt(jnp.maximum(jnp.sum(t32 * t32, axis=-1, keepdims=True),
                                      _EPS * _EPS))
    a_mm = a_n.astype(mxu_dtype)          # [N, D]
    t_mm = t_n.T.astype(mxu_dtype)        # [D, N] — contraction dim on RHS sublanes

    # Rank-1 identity on the SAME operands the kernel sees:
    #   sum_ij S_ij = inv_tau * (sum_i a_i) . (sum_j t_j)
    sum_s = inv_tau * jnp.dot(jnp.sum(a_mm.astype(jnp.float32), axis=0),
                              jnp.sum(t_mm.astype(jnp.float32), axis=1),
                              precision=lax.Precision.HIGHEST)

    # ---- tile sizes (sublane mult-of-8 rows; 128-mult lane columns when tiled) ----
    n8 = _round_up(n, 8)
    tm = n8 if n8 <= block_m else _round_up(block_m, 8)
    tn = n8 if n8 <= block_n else _round_up(block_n, 128)
    n_rows = _round_up(n, tm)
    n_cols = _round_up(n, tn)
    if n_rows != n:
        a_mm = jnp.pad(a_mm, ((0, n_rows - n), (0, 0)))
    if n_cols != n:
        t_mm = jnp.pad(t_mm, ((0, 0), (0, n_cols - n)))
    ni, nj = n_rows // tm, n_cols // tn

    kernel = functools.partial(
        _ntxent_kernel, inv_tau=inv_tau, tm=tm, tn=tn, n_valid=n,
        mask_rows=(n_rows != n), mask_cols=(n_cols != n))

    row_lse, col_stats = pl.pallas_call(
        kernel,
        out_shape=(jax.ShapeDtypeStruct((n_rows, 1), jnp.float32),
                   jax.ShapeDtypeStruct((ni, 8, n_cols), jnp.float32)),
        grid_spec=pltpu.PrefetchScalarGridSpec(
            num_scalar_prefetch=0,
            grid=(ni, nj),
            in_specs=[
                pl.BlockSpec((tm, d), lambda i, j: (i, 0)),   # audio rows (resident over j)
                pl.BlockSpec((d, tn), lambda i, j: (0, j)),   # text cols (streamed)
            ],
            out_specs=[
                pl.BlockSpec((tm, 1), lambda i, j: (i, 0)),        # per-row LSE
                pl.BlockSpec((1, 8, tn), lambda i, j: (i, 0, j)),  # per-tile col stats
            ],
            scratch_shapes=[
                pltpu.VMEM((tm, 1), jnp.float32),   # running row max
                pltpu.VMEM((tm, 1), jnp.float32),   # running row sum-exp
            ],
        ),
        compiler_params=pltpu.CompilerParams(
            # Row axis carries no cross-block state -> shardable across v7x's 2 TCs.
            dimension_semantics=("parallel", "arbitrary"),
            # Below v7x's 64 MiB physical VMEM; ample for 512-tiles on v5e/v6e.
            vmem_limit_bytes=48 * 1024 * 1024,
        ),
    )(a_mm, t_mm)

    # ---- tiny O(N) epilogue: merge partial column stats, sum the LSEs ----
    row_ok = jnp.arange(n_rows) < n
    row_lse_sum = jnp.sum(jnp.where(row_ok, row_lse[:, 0], 0.0))

    cm = col_stats[:, 0, :]                       # [ni, n_cols] per-tile col max
    cl = col_stats[:, 1, :]                       # [ni, n_cols] per-tile col sum-exp
    cmax = jnp.max(cm, axis=0)                    # [n_cols]
    lsum = jnp.sum(cl * jnp.exp(cm - cmax[None, :]), axis=0)
    col_ok = jnp.arange(n_cols) < n
    col_lse = cmax + jnp.log(jnp.where(col_ok, lsum, 1.0))
    col_lse_sum = jnp.sum(jnp.where(col_ok, col_lse, 0.0))

    inv_n = 1.0 / n
    return -sum_s * (inv_n * inv_n) + 0.5 * (row_lse_sum + col_lse_sum) * inv_n


def _reference(audio, text, tau=TAU, cast_dtype=None):
    a = audio.astype(jnp.float32)
    t = text.astype(jnp.float32)
    a = a / jnp.maximum(jnp.linalg.norm(a, axis=-1, keepdims=True), _EPS)
    t = t / jnp.maximum(jnp.linalg.norm(t, axis=-1, keepdims=True), _EPS)
    if cast_dtype is not None:                       # apples-to-apples with bf16 MXU
        a = a.astype(cast_dtype).astype(jnp.float32)
        t = t.astype(cast_dtype).astype(jnp.float32)
    a2t = jnp.matmul(a, t.T, precision=lax.Precision.HIGHEST) / tau
    a2t_loss = -jnp.mean(jax.nn.log_softmax(a2t, axis=1))
    t2a_loss = -jnp.mean(jax.nn.log_softmax(a2t.T, axis=1))
    return 0.5 * a2t_loss + 0.5 * t2a_loss


if __name__ == "__main__":
    key = jax.random.PRNGKey(0)
    k1, k2, k3, k4 = jax.random.split(key, 4)

    # Case 1: tiny single-tile shapes (batch 8, dim 32).
    n, d = 8, 32
    audio = jax.random.normal(k1, (n, d), dtype=jnp.float32)
    text = jax.random.normal(k2, (n, d), dtype=jnp.float32)
    labels = jnp.arange(n, dtype=jnp.int32)          # unused by forward, like the module

    loss_bf16 = jax.block_until_ready(ntxent_loss(audio, text, labels))
    ref_bf16 = _reference(audio, text, cast_dtype=jnp.bfloat16)
    ref_f32 = _reference(audio, text)
    assert jnp.allclose(loss_bf16, ref_bf16, rtol=2e-3, atol=2e-3), (loss_bf16, ref_bf16)
    assert jnp.allclose(loss_bf16, ref_f32, rtol=3e-2, atol=5e-2), (loss_bf16, ref_f32)

    loss_f32 = jax.block_until_ready(
        ntxent_loss(audio, text, labels, mxu_dtype=jnp.float32))
    assert jnp.allclose(loss_f32, ref_f32, rtol=2e-3, atol=2e-3), (loss_f32, ref_f32)

    # Case 2: multi-tile grid (4x2) with row AND column padding / masking.
    n2, d2 = 200, 32
    audio2 = jax.random.normal(k3, (n2, d2), dtype=jnp.float32)
    text2 = jax.random.normal(k4, (n2, d2), dtype=jnp.float32)
    labels2 = jnp.arange(n2, dtype=jnp.int32)

    loss2 = jax.block_until_ready(
        ntxent_loss(audio2, text2, labels2, block_m=64, block_n=128))
    ref2_bf16 = _reference(audio2, text2, cast_dtype=jnp.bfloat16)
    ref2_f32 = _reference(audio2, text2)
    assert jnp.allclose(loss2, ref2_bf16, rtol=2e-3, atol=2e-3), (loss2, ref2_bf16)
    assert jnp.allclose(loss2, ref2_f32, rtol=3e-2, atol=5e-2), (loss2, ref2_f32)

    loss2_f32 = jax.block_until_ready(
        ntxent_loss(audio2, text2, labels2, block_m=64, block_n=128,
                    mxu_dtype=jnp.float32))
    assert jnp.allclose(loss2_f32, ref2_f32, rtol=2e-3, atol=2e-3), (loss2_f32, ref2_f32)

    print("KERNEL_OK")
</pallas_src>

<mosaic_0001>
module attributes {stable_mosaic.version = 11 : i64} {
  func.func @_ntxent_kernel(%arg0: i32, %arg1: i32, %arg2: memref<8x32xbf16, #tpu.memory_space<vmem>>, %arg3: memref<32x8xbf16, #tpu.memory_space<vmem>>, %arg4: memref<8x1xf32, #tpu.memory_space<vmem>>, %arg5: memref<1x8x8xf32, #tpu.memory_space<vmem>>, %arg6: memref<8x1xf32, #tpu.memory_space<vmem>>, %arg7: memref<8x1xf32, #tpu.memory_space<vmem>>) attributes {dimension_semantics = [#tpu.dimension_semantics<parallel>, #tpu.dimension_semantics<arbitrary>], iteration_bounds = array<i64: 1, 1>, scalar_prefetch = 0 : i64, scratch_operands = 2 : i64, tpu.core_type = #tpu.core_type<tc>, window_params = [{transform_indices = @transform_0, window_bounds = array<i64: 8, 32>}, {transform_indices = @transform_1, window_bounds = array<i64: 32, 8>}, {transform_indices = @transform_2, window_bounds = array<i64: 8, 1>}, {transform_indices = @transform_3, window_bounds = array<i64: 1, 8, 8>}]} {
    %c0_i32 = arith.constant 0 : i32
    %0 = arith.cmpi eq, %arg1, %c0_i32 : i32
    %1 = arith.extui %0 : i1 to i32
    %c0_i32_0 = arith.constant 0 : i32
    %2 = arith.cmpi ne, %1, %c0_i32_0 : i32
    scf.if %2 {
      %cst_24 = arith.constant -1.000000e+30 : f32
      %43 = vector.broadcast %cst_24 : f32 to vector<8x1xf32>
      %c0_25 = arith.constant 0 : index
      %c0_26 = arith.constant 0 : index
      %44 = vector.load %arg6[%c0_25, %c0_26] : memref<8x1xf32, #tpu.memory_space<vmem>>, vector<8x1xf32>
      tpu.vector_store %arg6[%c0_25, %c0_26], %43 {strides = array<i32>} : memref<8x1xf32, #tpu.memory_space<vmem>>, vector<8x1xf32>,
      %cst_27 = arith.constant 0.000000e+00 : f32
      %45 = vector.broadcast %cst_27 : f32 to vector<8x1xf32>
      %c0_28 = arith.constant 0 : index
      %c0_29 = arith.constant 0 : index
      %46 = vector.load %arg7[%c0_28, %c0_29] : memref<8x1xf32, #tpu.memory_space<vmem>>, vector<8x1xf32>
      tpu.vector_store %arg7[%c0_28, %c0_29], %45 {strides = array<i32>} : memref<8x1xf32, #tpu.memory_space<vmem>>, vector<8x1xf32>,
    } else {
    }
    %c0 = arith.constant 0 : index
    %c0_1 = arith.constant 0 : index
    %3 = vector.load %arg2[%c0, %c0_1] : memref<8x32xbf16, #tpu.memory_space<vmem>>, vector<8x32xbf16>
    %c0_2 = arith.constant 0 : index
    %c0_3 = arith.constant 0 : index
    %4 = vector.load %arg3[%c0_2, %c0_3] : memref<32x8xbf16, #tpu.memory_space<vmem>>, vector<32x8xbf16>
    %cst = arith.constant dense<0.000000e+00> : vector<8x8xf32>
    %5 = tpu.matmul %3, %4, %cst {dimension_numbers = #tpu.dot_dimension_numbers<[1], [0], [0], [1], [0, 0, 1, 1], [], []>} : vector<8x32xbf16>, vector<32x8xbf16>, vector<8x8xf32> -> vector<8x8xf32>
    %cst_4 = arith.constant 14.2857141 : f32
    %6 = vector.broadcast %cst_4 : f32 to vector<8x8xf32>
    %7 = arith.mulf %5, %6 : vector<8x8xf32>
    %c0_5 = arith.constant 0 : index
    %c0_6 = arith.constant 0 : index
    %8 = vector.load %arg6[%c0_5, %c0_6] : memref<8x1xf32, #tpu.memory_space<vmem>>, vector<8x1xf32>
    %cst_7 = arith.constant dense<0xFF800000> : vector<8xf32>
    %9 = vector.multi_reduction <maximumf>, %7, %cst_7 [1] : vector<8x8xf32> to vector<8xf32>
    %10 = vector.shape_cast %9 : vector<8xf32> to vector<8x1xf32>
    %11 = arith.maximumf %8, %10 : vector<8x1xf32>
    %12 = vector.broadcast %11 : vector<8x1xf32> to vector<8x8xf32>
    %13 = arith.subf %7, %12 : vector<8x8xf32>
    %14 = math.exp %13 : vector<8x8xf32>
    %c0_8 = arith.constant 0 : index
    %c0_9 = arith.constant 0 : index
    %15 = vector.load %arg7[%c0_8, %c0_9] : memref<8x1xf32, #tpu.memory_space<vmem>>, vector<8x1xf32>
    %16 = arith.subf %8, %11 : vector<8x1xf32>
    %17 = math.exp %16 : vector<8x1xf32>
    %18 = arith.mulf %15, %17 : vector<8x1xf32>
    %cst_10 = arith.constant dense<0.000000e+00> : vector<8xf32>
    %19 = vector.multi_reduction <add>, %14, %cst_10 [1] : vector<8x8xf32> to vector<8xf32>
    %20 = vector.shape_cast %19 : vector<8xf32> to vector<8x1xf32>
    %21 = arith.addf %18, %20 : vector<8x1xf32>
    %c0_11 = arith.constant 0 : index
    %c0_12 = arith.constant 0 : index
    %22 = vector.load %arg7[%c0_11, %c0_12] : memref<8x1xf32, #tpu.memory_space<vmem>>, vector<8x1xf32>
    tpu.vector_store %arg7[%c0_11, %c0_12], %21 {strides = array<i32>} : memref<8x1xf32, #tpu.memory_space<vmem>>, vector<8x1xf32>,
    %c0_13 = arith.constant 0 : index
    %c0_14 = arith.constant 0 : index
    %23 = vector.load %arg6[%c0_13, %c0_14] : memref<8x1xf32, #tpu.memory_space<vmem>>, vector<8x1xf32>
    tpu.vector_store %arg6[%c0_13, %c0_14], %11 {strides = array<i32>} : memref<8x1xf32, #tpu.memory_space<vmem>>, vector<8x1xf32>,
    %cst_15 = arith.constant dense<0xFF800000> : vector<8xf32>
    %24 = vector.multi_reduction <maximumf>, %7, %cst_15 [0] : vector<8x8xf32> to vector<8xf32>
    %25 = vector.shape_cast %24 : vector<8xf32> to vector<1x8xf32>
    %26 = math.exp %11 : vector<8x1xf32>
    %27 = vector.broadcast %26 : vector<8x1xf32> to vector<8x8xf32>
    %28 = arith.mulf %14, %27 : vector<8x8xf32>
    %cst_16 = arith.constant dense<0.000000e+00> : vector<8xf32>
    %29 = vector.multi_reduction <add>, %28, %cst_16 [0] : vector<8x8xf32> to vector<8xf32>
    %30 = vector.shape_cast %29 : vector<8xf32> to vector<1x8xf32>
    %cst_17 = arith.constant 0.000000e+00 : f32
    %31 = vector.broadcast %cst_17 : f32 to vector<1x8xf32>
    %32 = arith.subf %31, %25 : vector<1x8xf32>
    %33 = math.exp %32 : vector<1x8xf32>
    %34 = arith.mulf %30, %33 : vector<1x8xf32>
    %cst_18 = arith.constant 0.000000e+00 : f32
    %35 = vector.broadcast %cst_18 : f32 to vector<6x8xf32>
    %36 = tpu.concatenate %25, %34, %35 in 0 : vector<1x8xf32>, vector<1x8xf32>, vector<6x8xf32> -> vector<8x8xf32>
    %c0_19 = arith.constant 0 : index
    %c0_20 = arith.constant 0 : index
    %c0_21 = arith.constant 0 : index
    %37 = vector.load %arg5[%c0_19, %c0_20, %c0_21] : memref<1x8x8xf32, #tpu.memory_space<vmem>>, vector<1x8x8xf32>
    %38 = vector.shape_cast %37 : vector<1x8x8xf32> to vector<8x8xf32>
    %39 = vector.shape_cast %36 : vector<8x8xf32> to vector<1x8x8xf32>
    tpu.vector_store %arg5[%c0_19, %c0_20, %c0_21], %39 {strides = array<i32>} : memref<1x8x8xf32, #tpu.memory_space<vmem>>, vector<1x8x8xf32>,
    %c0_i32_22 = arith.constant 0 : i32
    %40 = arith.cmpi eq, %arg1, %c0_i32_22 : i32
    %41 = arith.extui %40 : i1 to i32
    %c0_i32_23 = arith.constant 0 : i32
    %42 = arith.cmpi ne, %41, %c0_i32_23 : i32
    scf.if %42 {
      %c0_24 = arith.constant 0 : index
      %c0_25 = arith.constant 0 : index
      %43 = vector.load %arg6[%c0_24, %c0_25] : memref<8x1xf32, #tpu.memory_space<vmem>>, vector<8x1xf32>
      %c0_26 = arith.constant 0 : index
      %c0_27 = arith.constant 0 : index
      %44 = vector.load %arg7[%c0_26, %c0_27] : memref<8x1xf32, #tpu.memory_space<vmem>>, vector<8x1xf32>
      %45 = math.log %44 : vector<8x1xf32>
      %46 = arith.addf %43, %45 : vector<8x1xf32>
      %c0_28 = arith.constant 0 : index
      %c0_29 = arith.constant 0 : index
      %47 = vector.load %arg4[%c0_28, %c0_29] : memref<8x1xf32, #tpu.memory_space<vmem>>, vector<8x1xf32>
      tpu.vector_store %arg4[%c0_28, %c0_29], %46 {strides = array<i32>} : memref<8x1xf32, #tpu.memory_space<vmem>>, vector<8x1xf32>,
    } else {
    }
    return
  }
  func.func @transform_0(%arg0: i32, %arg1: i32) -> (i32, i32) {
    %c0_i32 = arith.constant 0 : i32
    %c0_i32_0 = arith.constant 0 : i32
    return %arg0, %c0_i32 : i32, i32
  }
  func.func @transform_1(%arg0: i32, %arg1: i32) -> (i32, i32) {
    %c0_i32 = arith.constant 0 : i32
    %c0_i32_0 = arith.constant 0 : i32
    return %c0_i32, %arg1 : i32, i32
  }
  func.func @transform_2(%arg0: i32, %arg1: i32) -> (i32, i32) {
    %c0_i32 = arith.constant 0 : i32
    %c0_i32_0 = arith.constant 0 : i32
    return %arg0, %c0_i32 : i32, i32
  }
  func.func @transform_3(%arg0: i32, %arg1: i32) -> (i32, i32, i32) {
    %c0_i32 = arith.constant 0 : i32
    %c0_i32_0 = arith.constant 0 : i32
    return %arg0, %c0_i32, %arg1 : i32, i32, i32
  }
}

</mosaic_0001>

<bundles_post_ra>
// kernel: tpu_custom_call.1
= control target key start
LH: loop header
LB: loop body
LE: loop exit
PB: predicated region body
PF: predicated region fallthrough
CT: control target
= control target key end

     0   :  { %vm19_vm0 = vcmask 7168   ;;  %v224_v0 = vmov 0.0   ;;  %vm225_vm1 = vmmov 0   ;;  %s282_s0 = inlined_call_operand.vmem [shape: bf16[8,32], index: 0, kind: input, shape index: {}]   ;;  %s283_s1 = inlined_call_operand.vmem [shape: bf16[32,8], index: 1, kind: input, shape index: {}]   ;;  %s284_s2 = inlined_call_operand.vmem [shape: f32[8,1], index: 2, kind: output, shape index: {0}]   ;;  %s285_s3 = inlined_call_operand.hbm [shape: f32[1,8,8], index: 3, kind: output, shape index: {1}]  }
   0x1   :  { %21 = vst.msk [vmem:[#allocation3] sm:$0xff] %vm19_vm0, %v224_v0  ;;  %173 = vmatprep.subr.bf16.mxu0 %v224_v0  ;;  %v188_v1 = vld [vmem:[%s283_s1] sm:$0xff]   ;;  %177 = vmatprep.mubr.msk.bf16.mxu0 %vm225_vm1, %v224_v0 }
   0x2   :  { %9 = vsyncpa [#allocation5], 0  ;;  %174 = vmatpush3.bf16.msra.mxu0 %v188_v1  ;;  %v189_v2 = vld [vmem:[%s283_s1 + $0x8] sm:$0xff]   ;;  %v22_v3 = vld [vmem:[%s282_s0] sm:$0xf]  ;;  %vm39_vm2 = vcmask 261120  }
   0x3   :  { %175 = vmatprep.subr.bf16.mxu0 %v224_v0  ;;  %vm85_vm3 = vcmask 64512   ;;  %v226_v10 = vmov -1e+30   ;;  %v227_v11 = vmov 0   ;;  %vm135_vm4 = vcmask 1040384   ;;  %s228_s0 = smov [#allocation4]  }
   0x4   :  { %20 = vst.msk [vmem:[#allocation2] sm:$0xff] %vm19_vm0, %v226_v10  ;;  %186 = vset.pattern.permute.xlu0 %v227_v11  ;;  %187 = vset.pattern.permute.xlu1 %v227_v11  ;;  %s157_s1 = sshll.u32 %s228_s0, 4  ;;  %vm137_vm5 = vcmask 1041408   ;;  %s158_s1 = int_to_ptr.vmem [resolvable:$true] %s157_s1 }
   0x5   :  { %s200_s18 = scalar_lea.vmem %s158_s1, 128  ;;  %p205_p1 = scmp.lt.s32.totalorder %s158_s1, %s158_s1 }
   0x6   :  { %176 = vmatpush3.bf16.msra.mxu0 %v189_v2  ;;  %p201_p0 = scmp.ne.s32.totalorder %s158_s1, %s200_s18  ;;  %p206_p2 = scmp.lt.s32.totalorder %s200_s18, %s200_s18 }
   0x8   :  { %v98_v30 = vld [vmem:[#allocation3] sm:$0xff]  ;;  %p207_p3 = por %p206_p2, %p205_p1 }
   0x9   :  { %178 = vmatmul.mubr.msk.bf16.vlgmr.msra.gmra.mrb[0].mxu0 %vm39_vm2, %v22_v3 }
   0xa   :  { %p208_p4 = pnand %p207_p3, %p201_p0 }
   0xb   :  { %v84_v12 = vld [vmem:[#allocation2] sm:$0xff] }
  0xdc   :  { %v77_v4 = vpop.f32.mrb[0].mxu0 }
  0xdd   :  { %v83_v5 = vmul.f32 14.285714, %v77_v4  ;;  %v179_v6 = vpop.f32.mrb[1].mxu0 }
  0xde   :  { %v80_v7 = vpop.f32.mrb[2].mxu0 }
  0xdf   :  { %v180_v8 = vpop.f32.mrb[3].mxu0  ;;  %v86_v9 = vsel %vm85_vm3, %v83_v5, -inf }
  0xe0   :  { %87 = vmax.xlane.f32.xlu0 %v86_v9  ;;  %v110_v23 = vrot.slane %v86_v9, 4 }
  0xe2   :  { %v111_v24 = vmax.f32 %v86_v9, %v110_v23 }
  0xe4   :  { %v112_v26 = vrot.slane %v111_v24, 2 }
  0xe6   :  { %v113_v27 = vmax.f32 %v111_v24, %v112_v26 }
  0xe8   :  { %v114_v28 = vrot.slane %v113_v27, 1 }
  0xea   :  { %v115_v31 = vmax.f32 %v113_v27, %v114_v28 }
  0xec   :  { %v131_v34 = vsub.f32 0.0, %v115_v31 }
  0xee   :  { %v132_v37 = vmul.f32 1.442695, %v131_v34 }
 0x16d   :  { %v88_v13 = vpop.xlane.xlu0 %87 }
 0x16e   :  { %v89_v14 = vmax.f32 %v84_v12, %v88_v13 }
 0x170   :  { %v99_v15 = vsub.f32 %v84_v12, %v89_v14  ;;  %109 = vst.msk [vmem:[#allocation2] sm:$0xff] %vm19_vm0, %v89_v14  ;;  %92 = vperm.xlu0 %186, %v89_v14   ;;  %v116_v21 = vmul.f32 1.442695, %v89_v14 }
 0x172   :  { %v100_v25 = vmul.f32 1.442695, %v99_v15 }
 0x177   :  { %v143_v52 = vld [vmem:[#allocation2] sm:$0xff] }
 0x1ef   :  { %v93_v16 = vpop.permute.xlu0 %92 }
 0x1f0   :  { %v95_v17 = vsub.f32 %v83_v5, %v93_v16 }
 0x1f2   :  { %v96_v18 = vmul.f32 1.442695, %v95_v17 }
 0x1f4   :  { %190 = vpow2.f32 %v96_v18 }
 0x1f5   :  { %192 = vpow2.f32 %v116_v21 }
 0x1f6   :  { %194 = vpow2.f32 %v100_v25 }
 0x1f7   :  { %196 = vpow2.f32 %v132_v37 }
 0x1fe   :  { %v191_v19 = vpop.eup %190 }
 0x1ff   :  { %v103_v20 = vsel %vm85_vm3, %v191_v19, 0.0  ;;  %v193_v22 = vpop.eup %192 }
 0x200   :  { %104 = vadd.xlane.f32.xlu1 %v103_v20  ;;  %v195_v29 = vpop.eup %194 }
 0x201   :  { %v102_v32 = vmul.f32 %v195_v29, %v98_v30  ;;  %v197_v47 = vpop.eup %196 }
 0x211   :  { %120 = vperm.xlu1 %187, %v193_v22  }
 0x28d   :  { %v105_v33 = vpop.xlane.xlu1 %104 }
 0x28e   :  { %v106_v35 = vadd.f32 %v105_v33, %v102_v32 }
 0x290   :  { %108 = vst.msk [vmem:[#allocation3] sm:$0xff] %vm19_vm0, %v106_v35 }
 0x291   :  { %v121_v36 = vpop.permute.xlu1 %120 }
 0x292   :  { %v123_v38 = vmul.f32 %v191_v19, %v121_v36 }
 0x294   :  { %v124_v39 = vsel %vm85_vm3, %v123_v38, 0.0 }
 0x295   :  { %v125_v40 = vrot.slane %v124_v39, 4 }
 0x297   :  { %v144_v41 = vld [vmem:[#allocation3] sm:$0xff]  ;;  %v126_v42 = vadd.f32 %v125_v40, %v124_v39 }
 0x298   :  { %198 = vlog2.f32 %v144_v41 }
 0x299   :  { %v127_v43 = vrot.slane %v126_v42, 2 }
 0x29b   :  { %v128_v44 = vadd.f32 %v127_v43, %v126_v42 }
 0x29d   :  { %v129_v45 = vrot.slane %v128_v44, 1 }
 0x29f   :  { %v130_v46 = vadd.f32 %v129_v45, %v128_v44 }
 0x2a1   :  { %v134_v48 = vmul.f32 %v197_v47, %v130_v46 }
 0x2a2   :  { %v199_v49 = vpop.eup %198 }
 0x2a3   :  { %v146_v50 = vmul.f32 0.6931472, %v199_v49  ;;  %v136_v51 = vsel %vm135_vm4, %v115_v31, %v134_v48 }
 0x2a4   :  { %v138_v53 = vsel %vm137_vm5, %v136_v51, 0.0 }
 0x2a5   :  { %v147_v54 = vadd.f32 %v146_v50, %v143_v52  ;;  %139 = vst.msk [vmem:[#allocation4] sm:$0xff] %vm85_vm3, %v138_v53 }
 0x2a6   :  { %211 = shalt.err (!%p208_p4)
}
 0x2a7   :  { %s212_s21 = scalar_lea.hbm %s285_s3, 128 }
 0x2a8   :  { %p213_p5 = scmp.ne.s32.totalorder %s285_s3, %s212_s21  ;;  %p216_p6 = scmp.lt.u32.totalorder %s212_s21, %s285_s3 }
 0x2aa   :  { %p218_p7 = pnand %p216_p6, %p213_p5 }
 0x2ac   :  { %221 = shalt.err (!%p218_p7)
}
 0x2ad   :  { %160 = dma.vmem_to_hbm [thread:$0]  %s158_s1, 128, %s285_s3, [#allocation5]   ;;  %148 = vst.msk [vmem:[%s284_s2] sm:$0xff] %vm19_vm0, %v147_v54 }
 0x2ae   :  { %222 = dma.done.wait [#allocation5], 128  }
 0x2af   :  { %223 = vsyncadd [#allocation5], 4294967168 }
 0x2b0   :  { %166 = vsyncpa [#allocation5], 1 }

</bundles_post_ra>
